<compile_context>
chip_gen: v7x
topology: tpu7x:2x2x1
jax: 0.10.0
libtpu: 0.0.40
codegen_flags: <defaults>
</compile_context>

<pallas_src>
from typing import NamedTuple

import jax
import jax.numpy as jnp
from jax.experimental import pallas as pl
from jax.experimental.pallas import tpu as pltpu

LANE = 128
SUBLANE = 8


def _round_up(n: int, m: int) -> int:
    return ((n + m - 1) // m) * m


def _cdiv(a: int, b: int) -> int:
    return (a + b - 1) // b


def _device_kind() -> str:
    try:
        return jax.devices()[0].device_kind.lower()
    except Exception:
        return ""


def _is_v7x(kind: str) -> bool:
    return ("v7" in kind) or ("7x" in kind)


# ----------------------------------------------------------------------------
# Kernel
# ----------------------------------------------------------------------------
def statenet_kernel(x_ref, w1_ref, b1_ref, w2_ref, b2_ref, o_ref):
    # observation_net: Linear + ReLU. bf16 MXU operands, f32 accumulation,
    # bias-add + ReLU in f32 on the VPU.
    h = jnp.dot(x_ref[...], w1_ref[...], preferred_element_type=jnp.float32)
    h = jnp.maximum(h + b1_ref[...], 0.0)
    # main_net: Linear. Re-cast h to the MXU operand dtype for the second
    # matmul, accumulate in f32, add bias in f32, store lane-dense.
    y = jnp.dot(h.astype(w2_ref.dtype), w2_ref[...],
                preferred_element_type=jnp.float32)
    o_ref[...] = (y + b2_ref[...]).astype(o_ref.dtype)


# ----------------------------------------------------------------------------
# Parameter preparation (hoisted out of the per-call path)
# ----------------------------------------------------------------------------
class StateNetParams(NamedTuple):
    """Padded + pre-cast parameters; build once with prepare_statenet_params."""
    w1_p: jax.Array   # [flat_p, obs_p]  compute_dtype
    b1_p: jax.Array   # [1, obs_p]       f32
    w2_p: jax.Array   # [obs_p, rep_p]   compute_dtype
    b2_p: jax.Array   # [1, rep_p]       f32
    flat: int
    obs: int
    rep: int


def prepare_statenet_params(w1, b1, w2, b2, *, compute_dtype=jnp.bfloat16):
    flat, obs = w1.shape
    obs2, rep = w2.shape
    assert obs2 == obs
    b1 = jnp.asarray(b1).reshape(1, obs).astype(jnp.float32)
    b2 = jnp.asarray(b2).reshape(1, rep).astype(jnp.float32)
    flat_p = _round_up(flat, LANE)
    obs_p = _round_up(obs, LANE)
    rep_p = _round_up(rep, LANE)
    # Zero padding is exact: padded w1 columns + zero b1 give h = ReLU(0) = 0,
    # and padded w2 rows/cols are zero, so the valid [:bs, :rep] slice of the
    # output is identical to the unpadded math.
    w1c = w1.astype(compute_dtype)
    w2c = w2.astype(compute_dtype)
    if (flat_p, obs_p) != (flat, obs):
        w1c = jnp.zeros((flat_p, obs_p), compute_dtype).at[:flat, :obs].set(w1c)
    if (obs_p, rep_p) != (obs, rep):
        w2c = jnp.zeros((obs_p, rep_p), compute_dtype).at[:obs, :rep].set(w2c)
    if obs_p != obs:
        b1 = jnp.zeros((1, obs_p), jnp.float32).at[:, :obs].set(b1)
    if rep_p != rep:
        b2 = jnp.zeros((1, rep_p), jnp.float32).at[:, :rep].set(b2)
    return StateNetParams(w1c, b1, w2c, b2, flat, obs, rep)


# ----------------------------------------------------------------------------
# Tiling / VMEM sizing helpers
# ----------------------------------------------------------------------------
def _vmem_footprint(tm, flat_p, obs_p, rep_p, in_bytes, out_bytes, w_bufs):
    x_b = 2 * tm * flat_p * in_bytes            # double-buffered input tile
    o_b = 2 * tm * rep_p * out_bytes            # double-buffered output tile
    w_b = w_bufs * ((flat_p * obs_p + obs_p * rep_p) * in_bytes
                    + (obs_p + rep_p) * 4)      # resident weights + f32 biases
    t_b = tm * obs_p * (4 + in_bytes)           # h (f32) + its bf16 re-cast
    return x_b + o_b + w_b + t_b


def _choose_batch_tile(bs, flat_p, obs_p, rep_p, in_bytes, out_bytes, *,
                       max_batch_tile, min_tiles, vmem_budget, w_bufs):
    bs8 = _round_up(bs, SUBLANE)
    # Balanced tiles: pick the tile count first, then an 8-aligned tile size,
    # so batch padding stays small (not round_up(bs, fixed_tm)).
    n = max(_cdiv(bs8, max_batch_tile), min(min_tiles, bs8 // SUBLANE))
    tm = _round_up(_cdiv(bs8, n), SUBLANE)
    # Cap the tile so the per-step footprint fits the per-chip VMEM budget.
    while tm > SUBLANE and _vmem_footprint(
            tm, flat_p, obs_p, rep_p, in_bytes, out_bytes, w_bufs) > vmem_budget:
        tm = max(SUBLANE, _round_up(tm // 2, SUBLANE))
    n = _cdiv(bs8, tm)
    return tm, n, tm * n


def _resident_spec(shape):
    """Constant-index weight/bias BlockSpec; single-buffered (never re-DMA'd)."""
    index_map = lambda i: (0,) * len(shape)
    if hasattr(pl, "Buffered"):
        try:
            return pl.BlockSpec(shape, index_map, pipeline_mode=pl.Buffered(1))
        except TypeError:
            pass
    return pl.BlockSpec(shape, index_map)


# ----------------------------------------------------------------------------
# Forward (StateNet._forward_ff)
# ----------------------------------------------------------------------------
def statenet_forward(state, params: StateNetParams, *, out_dtype=None,
                     max_batch_tile=None, return_padded=False):
    """StateNet._forward_ff: flatten -> Linear+ReLU -> Linear."""
    compute_dtype = params.w1_p.dtype
    out_dtype = compute_dtype if out_dtype is None else out_dtype

    bs = state.shape[0]
    x = state.reshape(bs, -1)                   # state.view(bs, -1)  (JAX glue)
    flat = x.shape[1]
    assert flat == params.flat, (flat, params.flat)
    flat_p, obs_p = params.w1_p.shape
    rep_p = params.w2_p.shape[1]

    kind = _device_kind()
    v7x = _is_v7x(kind)
    if max_batch_tile is None:
        # v5e/v6e: one TC, 128 MiB VMEM -> as few grid steps as possible.
        # v7x: 64 MiB VMEM/TC -> smaller cap; >=2 tiles forced via min_tiles.
        max_batch_tile = 1024 if v7x else 2048
    min_tiles = 2 if v7x else 1
    vmem_budget = (40 if v7x else 96) * (2 ** 20)

    in_bytes = jnp.dtype(compute_dtype).itemsize
    out_bytes = jnp.dtype(out_dtype).itemsize
    w_bufs = 1  # weights are single-buffered (constant index_map + Buffered(1))

    tm, n_tiles, bs_p = _choose_batch_tile(
        bs, flat_p, obs_p, rep_p, in_bytes, out_bytes,
        max_batch_tile=max_batch_tile, min_tiles=min_tiles,
        vmem_budget=vmem_budget, w_bufs=w_bufs)

    # Cast to the compute dtype *before* padding (single HBM pass) and skip the
    # pad copy entirely when no padding is needed.
    x = x.astype(compute_dtype)
    if (bs_p, flat_p) != (bs, flat):
        x = jnp.zeros((bs_p, flat_p), compute_dtype).at[:bs, :flat].set(x)

    footprint = _vmem_footprint(tm, flat_p, obs_p, rep_p, in_bytes, out_bytes,
                                w_bufs)
    vmem_limit = int(min(64 * (2 ** 20), max(int(footprint * 1.5), 8 * (2 ** 20))))

    flops = 2 * bs_p * (flat_p * obs_p + obs_p * rep_p)
    bytes_accessed = (bs_p * flat_p * in_bytes
                      + (flat_p * obs_p + obs_p * rep_p) * in_bytes
                      + (obs_p + rep_p) * 4
                      + bs_p * rep_p * out_bytes)

    out_p = pl.pallas_call(
        statenet_kernel,
        out_shape=jax.ShapeDtypeStruct((bs_p, rep_p), out_dtype),
        grid_spec=pltpu.PrefetchScalarGridSpec(
            num_scalar_prefetch=0,
            grid=(n_tiles,),
            in_specs=[
                # batch-tiled activations
                pl.BlockSpec((tm, flat_p), lambda i: (i, 0)),
                # weights / biases: constant index_map -> VMEM-resident
                _resident_spec((flat_p, obs_p)),
                _resident_spec((1, obs_p)),
                _resident_spec((obs_p, rep_p)),
                _resident_spec((1, rep_p)),
            ],
            out_specs=pl.BlockSpec((tm, rep_p), lambda i: (i, 0)),
        ),
        compiler_params=pltpu.CompilerParams(
            # batch tiles are independent -> shard across TCs (2x on v7x)
            dimension_semantics=("parallel",),
            vmem_limit_bytes=vmem_limit,
        ),
        cost_estimate=pl.CostEstimate(
            flops=flops, bytes_accessed=bytes_accessed, transcendentals=0),
    )(x, params.w1_p, params.b1_p, params.w2_p, params.b2_p)

    if return_padded:
        return out_p          # caller slices / fuses into its consumer
    return out_p[:bs, :params.rep]


# ----------------------------------------------------------------------------
# Reference + demo
# ----------------------------------------------------------------------------
def statenet_reference(state, w1, b1, w2, b2, *, compute_dtype=jnp.bfloat16,
                       out_dtype=jnp.bfloat16):
    """Pure-JAX reference with matching bf16-operand / f32-accumulate math."""
    bs = state.shape[0]
    x = state.reshape(bs, -1).astype(compute_dtype).astype(jnp.float32)
    w1c = w1.astype(compute_dtype).astype(jnp.float32)
    w2c = w2.astype(compute_dtype).astype(jnp.float32)
    h = jnp.maximum(x @ w1c + b1.reshape(1, -1), 0.0)
    hc = h.astype(compute_dtype).astype(jnp.float32)
    y = hc @ w2c + b2.reshape(1, -1)
    return y.astype(out_dtype).astype(jnp.float32)


def make_params(key, flat_features, obs_features, rep_size):
    k1, k2, k3, k4 = jax.random.split(key, 4)
    w1 = jax.random.uniform(k1, (flat_features, obs_features), jnp.float32, -0.05, 0.05)
    b1 = jax.random.uniform(k2, (1, obs_features), jnp.float32, -0.05, 0.05)
    w2 = jax.random.uniform(k3, (obs_features, rep_size), jnp.float32, -0.05, 0.05)
    b2 = jax.random.uniform(k4, (1, rep_size), jnp.float32, -0.05, 0.05)
    return w1, b1, w2, b2


if __name__ == "__main__":
    key = jax.random.PRNGKey(0)
    k_state, k_params, k_state_big = jax.random.split(key, 3)

    bs, history_len, in_features = 2, 8, 32
    obs_features, rep_size = 64, 32
    flat_features = history_len * in_features  # 256

    state = jax.random.normal(k_state, (bs, history_len, in_features), jnp.float32)
    w1, b1, w2, b2 = make_params(k_params, flat_features, obs_features, rep_size)

    # Pad + cast the parameters ONCE (hoisted out of the per-call path).
    params = prepare_statenet_params(w1, b1, w2, b2)

    # Small case (matches the module spec shapes); jit the whole forward so XLA
    # can schedule the cast/pad/slice glue around the (cost-estimated) kernel.
    fwd = jax.jit(lambda s: statenet_forward(s, params))
    out = jax.block_until_ready(fwd(state))
    assert out.shape == (bs, rep_size)

    ref_matched = statenet_reference(state, w1, b1, w2, b2)        # same bf16 math
    x_f32 = state.reshape(bs, -1)
    ref_f32 = jnp.maximum(x_f32 @ w1 + b1, 0.0) @ w2 + b2          # full f32 math
    out_f32 = out.astype(jnp.float32)
    assert jnp.allclose(out_f32, ref_matched, atol=2e-2, rtol=2e-2)
    assert jnp.allclose(out_f32, ref_f32, atol=6e-2, rtol=6e-2)

    # Larger batch: exercises the balanced batch tiles + "parallel" grid
    # (bs=600 -> tm=600/grid=1 on v5e/v6e, tm=304/grid=2 on v7x), with the
    # weights staying VMEM-resident across tiles.
    bs_big = 600
    state_big = jax.random.normal(
        k_state_big, (bs_big, history_len, in_features), jnp.float32)
    out_big = jax.block_until_ready(statenet_forward(state_big, params))
    ref_big = statenet_reference(state_big, w1, b1, w2, b2)
    assert out_big.shape == (bs_big, rep_size)
    assert jnp.allclose(out_big.astype(jnp.float32), ref_big, atol=2e-2, rtol=2e-2)

    print("KERNEL_OK")
</pallas_src>

<mosaic_0001>
module attributes {stable_mosaic.version = 11 : i64} {
  func.func @statenet_kernel(%arg0: i32, %arg1: memref<8x256xbf16, #tpu.memory_space<vmem>>, %arg2: memref<256x128xbf16, #tpu.memory_space<vmem>>, %arg3: memref<1x128xf32, #tpu.memory_space<vmem>>, %arg4: memref<128x128xbf16, #tpu.memory_space<vmem>>, %arg5: memref<1x128xf32, #tpu.memory_space<vmem>>, %arg6: memref<8x128xbf16, #tpu.memory_space<vmem>>) attributes {dimension_semantics = [#tpu.dimension_semantics<parallel>], iteration_bounds = array<i64: 1>, scalar_prefetch = 0 : i64, scratch_operands = 0 : i64, tpu.core_type = #tpu.core_type<tc>, window_params = [{transform_indices = @transform_0, window_bounds = array<i64: 8, 256>}, {pipeline_mode = #tpu.pipeline_mode<synchronous>, transform_indices = @transform_1, window_bounds = array<i64: 256, 128>}, {pipeline_mode = #tpu.pipeline_mode<synchronous>, transform_indices = @transform_2, window_bounds = array<i64: 1, 128>}, {pipeline_mode = #tpu.pipeline_mode<synchronous>, transform_indices = @transform_3, window_bounds = array<i64: 128, 128>}, {pipeline_mode = #tpu.pipeline_mode<synchronous>, transform_indices = @transform_4, window_bounds = array<i64: 1, 128>}, {transform_indices = @transform_5, window_bounds = array<i64: 8, 128>}]} {
    %c0 = arith.constant 0 : index
    %c0_0 = arith.constant 0 : index
    %0 = vector.load %arg1[%c0, %c0_0] : memref<8x256xbf16, #tpu.memory_space<vmem>>, vector<8x256xbf16>
    %c0_1 = arith.constant 0 : index
    %c0_2 = arith.constant 0 : index
    %1 = vector.load %arg2[%c0_1, %c0_2] : memref<256x128xbf16, #tpu.memory_space<vmem>>, vector<256x128xbf16>
    %cst = arith.constant dense<0.000000e+00> : vector<8x128xf32>
    %2 = tpu.matmul %0, %1, %cst {dimension_numbers = #tpu.dot_dimension_numbers<[1], [0], [0], [1], [0, 0, 1, 1], [], []>} : vector<8x256xbf16>, vector<256x128xbf16>, vector<8x128xf32> -> vector<8x128xf32>
    %c0_3 = arith.constant 0 : index
    %c0_4 = arith.constant 0 : index
    %3 = vector.load %arg3[%c0_3, %c0_4] : memref<1x128xf32, #tpu.memory_space<vmem>>, vector<1x128xf32>
    %4 = vector.broadcast %3 : vector<1x128xf32> to vector<8x128xf32>
    %5 = arith.addf %2, %4 : vector<8x128xf32>
    %cst_5 = arith.constant 0.000000e+00 : f32
    %6 = vector.broadcast %cst_5 : f32 to vector<8x128xf32>
    %7 = arith.maximumf %5, %6 : vector<8x128xf32>
    %8 = arith.truncf %7 : vector<8x128xf32> to vector<8x128xbf16>
    %c0_6 = arith.constant 0 : index
    %c0_7 = arith.constant 0 : index
    %9 = vector.load %arg4[%c0_6, %c0_7] : memref<128x128xbf16, #tpu.memory_space<vmem>>, vector<128x128xbf16>
    %cst_8 = arith.constant dense<0.000000e+00> : vector<8x128xf32>
    %10 = tpu.matmul %8, %9, %cst_8 {dimension_numbers = #tpu.dot_dimension_numbers<[1], [0], [0], [1], [0, 0, 1, 1], [], []>} : vector<8x128xbf16>, vector<128x128xbf16>, vector<8x128xf32> -> vector<8x128xf32>
    %c0_9 = arith.constant 0 : index
    %c0_10 = arith.constant 0 : index
    %11 = vector.load %arg5[%c0_9, %c0_10] : memref<1x128xf32, #tpu.memory_space<vmem>>, vector<1x128xf32>
    %12 = vector.broadcast %11 : vector<1x128xf32> to vector<8x128xf32>
    %13 = arith.addf %10, %12 : vector<8x128xf32>
    %14 = arith.truncf %13 : vector<8x128xf32> to vector<8x128xbf16>
    %c0_11 = arith.constant 0 : index
    %c0_12 = arith.constant 0 : index
    %15 = vector.load %arg6[%c0_11, %c0_12] : memref<8x128xbf16, #tpu.memory_space<vmem>>, vector<8x128xbf16>
    tpu.vector_store %arg6[%c0_11, %c0_12], %14 {strides = array<i32>} : memref<8x128xbf16, #tpu.memory_space<vmem>>, vector<8x128xbf16>,
    return
  }
  func.func @transform_0(%arg0: i32) -> (i32, i32) {
    %c0_i32 = arith.constant 0 : i32
    %c0_i32_0 = arith.constant 0 : i32
    return %arg0, %c0_i32 : i32, i32
  }
  func.func @transform_1(%arg0: i32) -> (i32, i32) {
    %c0_i32 = arith.constant 0 : i32
    %c0_i32_0 = arith.constant 0 : i32
    %c0_i32_1 = arith.constant 0 : i32
    return %c0_i32, %c0_i32_0 : i32, i32
  }
  func.func @transform_2(%arg0: i32) -> (i32, i32) {
    %c0_i32 = arith.constant 0 : i32
    %c0_i32_0 = arith.constant 0 : i32
    %c0_i32_1 = arith.constant 0 : i32
    return %c0_i32, %c0_i32_0 : i32, i32
  }
  func.func @transform_3(%arg0: i32) -> (i32, i32) {
    %c0_i32 = arith.constant 0 : i32
    %c0_i32_0 = arith.constant 0 : i32
    %c0_i32_1 = arith.constant 0 : i32
    return %c0_i32, %c0_i32_0 : i32, i32
  }
  func.func @transform_4(%arg0: i32) -> (i32, i32) {
    %c0_i32 = arith.constant 0 : i32
    %c0_i32_0 = arith.constant 0 : i32
    %c0_i32_1 = arith.constant 0 : i32
    return %c0_i32, %c0_i32_0 : i32, i32
  }
  func.func @transform_5(%arg0: i32) -> (i32, i32) {
    %c0_i32 = arith.constant 0 : i32
    %c0_i32_0 = arith.constant 0 : i32
    return %arg0, %c0_i32 : i32, i32
  }
}

</mosaic_0001>

<bundles_post_ra>
// kernel: _lambda_.1
= control target key start
LH: loop header
LB: loop body
LE: loop exit
PB: predicated region body
PF: predicated region fallthrough
CT: control target
= control target key end

     0   :  { %10 = vsyncpa [#allocation3], 0  ;;  %s472_s18 = smov [#allocation2]   ;;  %s564_s0 = inlined_call_operand.vmem [shape: bf16[8,256], index: 0, kind: input, shape index: {}]   ;;  %s565_s1 = inlined_call_operand.hbm [shape: bf16[256,128], index: 1, kind: input, shape index: {}]   ;;  %s566_s2 = inlined_call_operand.vmem [shape: f32[1,128], index: 2, kind: input, shape index: {}]   ;;  %s567_s3 = inlined_call_operand.vmem [shape: bf16[128,128], index: 3, kind: input, shape index: {}]   ;;  %s568_s4 = inlined_call_operand.vmem [shape: f32[1,128], index: 4, kind: input, shape index: {}]   ;;  %s569_s5 = inlined_call_operand.vmem [shape: bf16[8,128], index: 5, kind: output, shape index: {}]  }
   0x1   :  { %s18_s19 = sshll.u32 %s472_s18, 4  ;;  %s448_s22 = scalar_lea.hbm %s565_s1, 2048  ;;  %s19_s19 = int_to_ptr.vmem [resolvable:$true] %s18_s19 }
   0x2   :  { %p449_p0 = scmp.ne.s32.totalorder %s565_s1, %s448_s22  ;;  %p452_p1 = scmp.lt.u32.totalorder %s448_s22, %s565_s1 }
   0x4   :  { %p454_p2 = pnand %p452_p1, %p449_p0 }
   0x6   :  { %457 = shalt.err (!%p454_p2)
}
   0x7   :  { %s458_s27 = scalar_lea.vmem %s19_s19, 2048  ;;  %p463_p4 = scmp.lt.s32.totalorder %s19_s19, %s19_s19 }
   0x8   :  { %p459_p3 = scmp.ne.s32.totalorder %s19_s19, %s458_s27  ;;  %p464_p5 = scmp.lt.s32.totalorder %s458_s27, %s458_s27 }
   0xa   :  { %p465_p6 = por %p464_p5, %p463_p4 }
   0xc   :  { %p466_p7 = pnand %p465_p6, %p459_p3 }
   0xe   :  { %469 = shalt.err (!%p466_p7)
}
   0xf   :  { %s473_s28 = smov 64   ;;  %s474_s29 = smov 4  }
  0x10   :  { %24 = dma.hbm_to_vmem [thread:$0]  %s565_s1, 2048, %s19_s19, [#allocation3], %s473_s28, %s473_s28, %s474_s29  }
  0x11   :  { %470 = dma.done.wait [#allocation3], 2048  }
  0x12   :  { %471 = vsyncadd [#allocation3], 4294965248  ;;  %v475_v0 = vmov 0.0   ;;  %v422_v1 = vld [vmem:[#allocation2 + $0x40] sm:$0xff]   ;;  %v424_v3 = vld [vmem:[#allocation2 + $0x48] sm:$0xff]   ;;  %vm476_vm0 = vmmov 0  }
  0x13   :  { %397 = vmatprep.subr.bf16.mxu1 %v475_v0  ;;  %v423_v2 = vld [vmem:[#allocation2] sm:$0xff]   ;;  %366 = vmatprep.subr.bf16.mxu0 %v422_v1  ;;  %v425_v4 = vld [vmem:[#allocation2 + $0x8] sm:$0xff]   ;;  %v426_v5 = vld [vmem:[#allocation2 + $0x50] sm:$0xff]  }
  0x14   :  { %367 = vmatpush3.bf16.msra.mxu0 %v423_v2  ;;  %v427_v6 = vld [vmem:[#allocation2 + $0x10] sm:$0xff]   ;;  %v428_v7 = vld [vmem:[#allocation2 + $0x58] sm:$0xff]   ;;  %v430_v9 = vld [vmem:[#allocation2 + $0x60] sm:$0xff]   ;;  %413 = vmatprep.mubr.msk.bf16.mxu1 %vm476_vm0, %v475_v0 }
  0x15   :  { %368 = vmatprep.subr.bf16.mxu0 %v424_v3  ;;  %v429_v8 = vld [vmem:[#allocation2 + $0x18] sm:$0xff]   ;;  %v431_v10 = vld [vmem:[#allocation2 + $0x20] sm:$0xff]   ;;  %v432_v11 = vld [vmem:[#allocation2 + $0x68] sm:$0xff]  }
  0x16   :  { %v35_v12 = vld [vmem:[%s564_s0] sm:$0xff]  ;;  %v433_v15 = vld [vmem:[#allocation2 + $0x28] sm:$0xff]   ;;  %v434_v16 = vld [vmem:[#allocation2 + $0x70] sm:$0xff]  }
  0x17   :  { %v340_v13 = vcombine.high %v35_v12, %v35_v12  ;;  %v440_v14 = vld [vmem:[%s567_s3] sm:$0xff]   ;;  %v441_v17 = vld [vmem:[%s567_s3 + $0x8] sm:$0xff]   ;;  %v435_v18 = vld [vmem:[#allocation2 + $0x30] sm:$0xff]   ;;  %v339_v23 = vcombine.low %v35_v12, %v35_v12 }
  0x18   :  { %369 = vmatpush3.bf16.msra.mxu0 %v425_v4  ;;  %398 = vmatpush3.bf16.msra.mxu1 %v440_v14  ;;  %v436_v19 = vld [vmem:[#allocation2 + $0x78] sm:$0xff]   ;;  %v442_v20 = vld [vmem:[%s567_s3 + $0x10] sm:$0xff]   ;;  %v444_v24 = vld [vmem:[%s567_s3 + $0x20] sm:$0xff]  }
  0x19   :  { %370 = vmatprep.subr.bf16.mxu0 %v426_v5  ;;  %210 = vmatprep.mubr.bf16.mxu0 %v340_v13  ;;  %v437_v21 = vld [vmem:[#allocation2 + $0x38] sm:$0xff]   ;;  %v445_v25 = vld [vmem:[%s567_s3 + $0x28] sm:$0xff]   ;;  %v446_v26 = vld [vmem:[%s567_s3 + $0x30] sm:$0xff]  }
  0x1a   :  { %399 = vmatprep.subr.bf16.mxu1 %v475_v0  ;;  %v443_v22 = vld [vmem:[%s567_s3 + $0x18] sm:$0xff]   ;;  %v338_v29 = vld [vmem:[%s566_s2] ss:$0 sm:$0xff] }
  0x1b   :  { %v447_v27 = vld [vmem:[%s567_s3 + $0x38] sm:$0xff]   ;;  %v357_v37 = vld [vmem:[%s568_s4] ss:$0 sm:$0xff] }
  0x1c   :  { %371 = vmatpush3.bf16.msra.mxu0 %v427_v6  ;;  %400 = vmatpush3.bf16.msra.mxu1 %v441_v17 }
  0x1d   :  { %372 = vmatprep.subr.bf16.mxu0 %v428_v7  ;;  %401 = vmatprep.subr.bf16.mxu1 %v475_v0 }
  0x20   :  { %373 = vmatpush3.bf16.msra.mxu0 %v429_v8  ;;  %402 = vmatpush3.bf16.msra.mxu1 %v442_v20 }
  0x21   :  { %374 = vmatprep.subr.bf16.mxu0 %v430_v9  ;;  %403 = vmatprep.subr.bf16.mxu1 %v475_v0 }
  0x24   :  { %375 = vmatpush3.bf16.msra.mxu0 %v431_v10  ;;  %404 = vmatpush3.bf16.msra.mxu1 %v443_v22 }
  0x25   :  { %376 = vmatprep.subr.bf16.mxu0 %v432_v11  ;;  %405 = vmatprep.subr.bf16.mxu1 %v475_v0 }
  0x28   :  { %377 = vmatpush3.bf16.msra.mxu0 %v433_v15  ;;  %406 = vmatpush3.bf16.msra.mxu1 %v444_v24 }
  0x29   :  { %378 = vmatprep.subr.bf16.mxu0 %v434_v16  ;;  %407 = vmatprep.subr.bf16.mxu1 %v475_v0 }
  0x2c   :  { %379 = vmatpush3.bf16.msra.mxu0 %v435_v18  ;;  %408 = vmatpush3.bf16.msra.mxu1 %v445_v25 }
  0x2d   :  { %380 = vmatprep.subr.bf16.mxu0 %v436_v19  ;;  %409 = vmatprep.subr.bf16.mxu1 %v475_v0 }
  0x30   :  { %381 = vmatpush3.bf16.msra.mxu0 %v437_v21  ;;  %410 = vmatpush3.bf16.msra.mxu1 %v446_v26 }
  0x31   :  { %411 = vmatprep.subr.bf16.mxu1 %v475_v0 }
  0x33   :  { %211 = vmatmul.mubr.bf16.vlgmr.msra.gmra.mrb[0].mxu0 %v339_v23 }
  0x34   :  { %412 = vmatpush3.bf16.msra.mxu1 %v447_v27 }
 0x106   :  { %v382_v28 = vpop.f32.mrb[0].mxu0 }
 0x107   :  { %v383_v30 = vpop.f32.mrb[1].mxu0 }
 0x108   :  { %v384_v31 = vadd.f32 %v383_v30, %v382_v28  ;;  %v385_v32 = vpop.f32.mrb[2].mxu0 }
 0x109   :  { %v386_v33 = vpop.f32.mrb[3].mxu0 }
 0x10a   :  { %v213_v34 = vadd.f32 %v384_v31, %v338_v29 }
 0x10c   :  { %v218_v35 = vmax.f32 %v213_v34, 0.0 }
 0x10e   :  { %v219_v36 = vpack.c.bf16 %v218_v35, %v218_v35 }
 0x110   :  { %414 = vmatmul.mubr.bf16.vlgmr.msra.gmra.mrb[0].mxu1 %v219_v36 }
 0x1e3   :  { %v325_v38 = vpop.f32.mrb[0].mxu1 }
 0x1e4   :  { %v326_v39 = vadd.f32 %v357_v37, %v325_v38  ;;  %v415_v40 = vpop.f32.mrb[1].mxu1 }
 0x1e5   :  { %v328_v41 = vpop.f32.mrb[2].mxu1 }
 0x1e6   :  { %v331_v42 = vpack.c.bf16 %v326_v39, %v326_v39  ;;  %v416_v43 = vpop.f32.mrb[3].mxu1 }
 0x1e8   :  { %332 = vst [vmem:[%s569_s5] sm:$0xf] %v331_v42 }
 0x1e9   :  { %337 = vsyncpa [#allocation3], 1 }

</bundles_post_ra>
